<compile_context>
chip_gen: v6e
topology: v6e:2x2x1
jax: 0.10.0
libtpu: 0.0.40
codegen_flags: <defaults>
</compile_context>

<pallas_src>
import functools

import jax
import jax.numpy as jnp
import numpy as np
from jax.experimental import pallas as pl
from jax.experimental.pallas import tpu as pltpu


def _round_up(x, m):
    return (x + m - 1) // m * m


# ---------------------- fused whole-stack kernel (small nets) ----------------

def _fused_mlp_kernel(*refs, num_layers, activations):
    """refs = (x_ref, w1, b1, w2, b2, ..., o_ref); one M-tile per grid step."""
    x_ref = refs[0]
    o_ref = refs[-1]
    h = x_ref[...]
    for l in range(num_layers):
        w_ref = refs[1 + 2 * l]
        b_ref = refs[2 + 2 * l]
        y = jnp.dot(h.astype(w_ref.dtype), w_ref[...],
                    preferred_element_type=jnp.float32) + b_ref[...]
        if activations[l]:
            y = jnp.maximum(y, 0.0)
        h = y
    o_ref[...] = h.astype(o_ref.dtype)


def _fused_forward(xp, prepared, activations, *, tm):
    """xp: (Mp, K0p) padded input. prepared: [(wtp (Kp,Np), bp (1,Np)), ...]."""
    Mp, K0p = xp.shape
    num_layers = len(prepared)
    Np_last = prepared[-1][0].shape[1]
    grid = (Mp // tm,)

    in_specs = [pl.BlockSpec((tm, K0p), lambda i: (i, 0))]
    flat_args = [xp]
    flops = 0
    bytes_accessed = xp.size * jnp.dtype(xp.dtype).itemsize + Mp * Np_last * 4
    for (wtp, bp) in prepared:
        Kp, Np = wtp.shape
        in_specs.append(pl.BlockSpec((Kp, Np), lambda i: (0, 0)))
        in_specs.append(pl.BlockSpec((1, Np), lambda i: (0, 0)))
        flat_args += [wtp, bp]
        flops += 2 * Mp * Kp * Np
        bytes_accessed += (wtp.size * jnp.dtype(wtp.dtype).itemsize
                           + bp.size * 4)

    kernel = functools.partial(_fused_mlp_kernel, num_layers=num_layers,
                               activations=tuple(activations))
    return pl.pallas_call(
        kernel,
        out_shape=jax.ShapeDtypeStruct((Mp, Np_last), jnp.float32),
        grid_spec=pltpu.PrefetchScalarGridSpec(
            num_scalar_prefetch=0,
            grid=grid,
            in_specs=in_specs,
            out_specs=pl.BlockSpec((tm, Np_last), lambda i: (i, 0)),
        ),
        compiler_params=pltpu.CompilerParams(
            dimension_semantics=("parallel",)),
        cost_estimate=pl.CostEstimate(flops=flops, transcendentals=0,
                                      bytes_accessed=bytes_accessed),
    )(*flat_args)


# -------------------- tiled per-layer fallback (large nets) ------------------

def _linear_bias_act_kernel(x_ref, w_ref, b_ref, o_ref, *, apply_relu):
    """Grid = (Mp/tm, Np/tn, Kp/tk), K innermost; accumulate into o_ref (f32)."""
    k = pl.program_id(2)

    @pl.when(k == 0)
    def _init():
        o_ref[...] = jnp.broadcast_to(b_ref[...], o_ref.shape)

    o_ref[...] += jnp.dot(x_ref[...].astype(w_ref.dtype), w_ref[...],
                          preferred_element_type=jnp.float32)

    if apply_relu:
        @pl.when(k == pl.num_programs(2) - 1)
        def _finalize():
            o_ref[...] = jnp.maximum(o_ref[...], 0.0)


def _tiled_linear(xp, wtp, bp, *, apply_relu, vmem_tile_budget=8 * 1024 * 1024):
    """xp: (Mp, Kp)  wtp: (Kp, Np)  bp: (1, Np)  ->  (Mp, Np) float32 (padded)."""
    Mp, Kp = xp.shape
    Np = wtp.shape[1]
    itemsize = jnp.dtype(wtp.dtype).itemsize

    tm = min(256, Mp)
    tn = min(256, Np)
    if Np % tn:
        tn = 128
    # Largest multiple-of-128 tk that divides Kp and keeps the double-buffered
    # x/w tiles under budget (full-K slab whenever it fits -> no K grid axis).
    tk = Kp
    while tk > 128 and (Kp % tk != 0
                        or 2 * (tm + tn) * tk * itemsize > vmem_tile_budget):
        tk -= 128
    grid = (Mp // tm, Np // tn, Kp // tk)

    cost = pl.CostEstimate(
        flops=2 * Mp * Kp * Np,
        transcendentals=0,
        bytes_accessed=itemsize * (Mp * Kp + Kp * Np) + 4 * (Np + Mp * Np),
    )
    kernel = functools.partial(_linear_bias_act_kernel, apply_relu=apply_relu)
    return pl.pallas_call(
        kernel,
        out_shape=jax.ShapeDtypeStruct((Mp, Np), jnp.float32),
        grid_spec=pltpu.PrefetchScalarGridSpec(
            num_scalar_prefetch=0,
            grid=grid,
            in_specs=[
                pl.BlockSpec((tm, tk), lambda i, j, k: (i, k)),
                pl.BlockSpec((tk, tn), lambda i, j, k: (k, j)),
                pl.BlockSpec((1, tn), lambda i, j, k: (0, j)),
            ],
            out_specs=pl.BlockSpec((tm, tn), lambda i, j, k: (i, j)),
        ),
        compiler_params=pltpu.CompilerParams(
            dimension_semantics=("parallel", "parallel", "arbitrary"),
            vmem_limit_bytes=32 * 1024 * 1024),
        cost_estimate=cost,
    )(xp, wtp, bp)


# --------------------------- parameter preparation ---------------------------

def prepare_params(params, compute_dtype=jnp.float32):
    """One-time weight prep: W (N,K) -> padded transposed (Kp, Np); b -> (1, Np).

    Zero padding is exact: padded columns produce 0 (+0 bias), ReLU(0)=0, and
    padded K rows contribute 0 to the next layer's matmul.
    """
    prepared, dims = [], []
    for (w, b) in params:
        N, K = w.shape
        Kp, Np = _round_up(K, 128), _round_up(N, 128)
        wtp = jnp.pad(w.T, ((0, Kp - K), (0, Np - N))).astype(compute_dtype)
        bp = jnp.pad(b.astype(jnp.float32).reshape(1, N),
                     ((0, 0), (0, Np - N)))
        prepared.append((wtp, bp))
        dims.append((K, N))
    return prepared, dims


# --------------------------------- forward -----------------------------------

def hebbnet_forward(x, prepared, dims, *, activation=True,
                    fused_vmem_budget=6 * 1024 * 1024):
    """HebbNet.forward with pre-padded params (see prepare_params)."""
    M, K0 = x.shape
    assert K0 == dims[0][0], (K0, dims[0][0])
    num_layers = len(prepared)
    acts = (bool(activation),) * num_layers
    compute_dtype = prepared[0][0].dtype

    K0p = prepared[0][0].shape[0]
    tm = min(256, _round_up(M, 8))
    Mp = _round_up(M, tm)
    xp = jnp.pad(x, ((0, Mp - M), (0, K0p - K0))).astype(compute_dtype)

    weight_bytes = sum(w.size * jnp.dtype(w.dtype).itemsize + b.size * 4
                       for (w, b) in prepared)
    act_bytes = 4 * tm * max(max(w.shape) for (w, _) in prepared)
    if 2 * weight_bytes + 4 * act_bytes < fused_vmem_budget:
        # Whole stack in one kernel: weights resident in VMEM, no HBM
        # round trips for intermediate activations.
        out = _fused_forward(xp, prepared, acts, tm=tm)
    else:
        # Large-layer fallback: tiled per-layer kernels; activations stay
        # padded across layers (padded-N of layer l == padded-K of layer l+1).
        h = xp
        for (wtp, bp), act in zip(prepared, acts):
            h = _tiled_linear(h, wtp, bp, apply_relu=act)
        out = h

    N_last = dims[-1][1]
    return out[:M, :N_last]


# --------------------------- parameter creation ------------------------------

def init_params(layer_sizes, key):
    """Mimic PyTorch nn.Linear default init (uniform +-1/sqrt(fan_in))."""
    params = []
    for i in range(len(layer_sizes) - 1):
        fan_in, fan_out = layer_sizes[i], layer_sizes[i + 1]
        key, kw_, kb_ = jax.random.split(key, 3)
        bound = 1.0 / np.sqrt(fan_in)
        w = jax.random.uniform(kw_, (fan_out, fan_in), jnp.float32, -bound, bound)
        b = jax.random.uniform(kb_, (fan_out,), jnp.float32, -bound, bound)
        params.append((w, b))
    return params


# ------------------------------- reference -----------------------------------

def reference_forward(x, params, *, activation=True):
    for (w, b) in params:
        y = x @ w.T + b
        x = jnp.maximum(y, 0.0) if activation else y
    return x


# ---------------------------------- main --------------------------------------

if __name__ == "__main__":
    # HebbNet(layer_sizes=[784, 256, 64, 10], lr=...): MNIST-style MLP.
    layer_sizes = [784, 256, 64, 10]
    batch = 16

    key = jax.random.PRNGKey(0)
    key, kx = jax.random.split(key)
    x = jax.random.normal(kx, (batch, layer_sizes[0]), jnp.float32)
    params = init_params(layer_sizes, key)

    # One-time weight prep (transpose + lane-dense zero pad), outside hot path.
    prepared, dims = prepare_params(params, compute_dtype=jnp.float32)

    fwd = jax.jit(lambda xx, pp: hebbnet_forward(xx, pp, dims, activation=True))
    out = jax.block_until_ready(fwd(x, prepared))

    ref = jax.block_until_ready(reference_forward(x, params, activation=True))
    np.testing.assert_allclose(np.asarray(out), np.asarray(ref),
                               rtol=1e-4, atol=1e-4)
    assert out.shape == (batch, layer_sizes[-1]), out.shape
    print("KERNEL_OK")
</pallas_src>

<mosaic_0001>
module attributes {stable_mosaic.version = 11 : i64} {
  func.func @_fused_mlp_kernel(%arg0: i32, %arg1: memref<16x896xf32, #tpu.memory_space<vmem>>, %arg2: memref<896x256xf32, #tpu.memory_space<vmem>>, %arg3: memref<1x256xf32, #tpu.memory_space<vmem>>, %arg4: memref<256x128xf32, #tpu.memory_space<vmem>>, %arg5: memref<1x128xf32, #tpu.memory_space<vmem>>, %arg6: memref<128x128xf32, #tpu.memory_space<vmem>>, %arg7: memref<1x128xf32, #tpu.memory_space<vmem>>, %arg8: memref<16x128xf32, #tpu.memory_space<vmem>>) attributes {dimension_semantics = [#tpu.dimension_semantics<parallel>], iteration_bounds = array<i64: 1>, scalar_prefetch = 0 : i64, scratch_operands = 0 : i64, tpu.core_type = #tpu.core_type<tc>, window_params = [{transform_indices = @transform_0, window_bounds = array<i64: 16, 896>}, {pipeline_mode = #tpu.pipeline_mode<synchronous>, transform_indices = @transform_1, window_bounds = array<i64: 896, 256>}, {pipeline_mode = #tpu.pipeline_mode<synchronous>, transform_indices = @transform_2, window_bounds = array<i64: 1, 256>}, {pipeline_mode = #tpu.pipeline_mode<synchronous>, transform_indices = @transform_3, window_bounds = array<i64: 256, 128>}, {pipeline_mode = #tpu.pipeline_mode<synchronous>, transform_indices = @transform_4, window_bounds = array<i64: 1, 128>}, {pipeline_mode = #tpu.pipeline_mode<synchronous>, transform_indices = @transform_5, window_bounds = array<i64: 128, 128>}, {pipeline_mode = #tpu.pipeline_mode<synchronous>, transform_indices = @transform_6, window_bounds = array<i64: 1, 128>}, {transform_indices = @transform_7, window_bounds = array<i64: 16, 128>}]} {
    %c0 = arith.constant 0 : index
    %c0_0 = arith.constant 0 : index
    %0 = vector.load %arg1[%c0, %c0_0] : memref<16x896xf32, #tpu.memory_space<vmem>>, vector<16x896xf32>
    %c0_1 = arith.constant 0 : index
    %c0_2 = arith.constant 0 : index
    %1 = vector.load %arg2[%c0_1, %c0_2] : memref<896x256xf32, #tpu.memory_space<vmem>>, vector<896x256xf32>
    %cst = arith.constant dense<0.000000e+00> : vector<16x256xf32>
    %2 = tpu.matmul %0, %1, %cst {dimension_numbers = #tpu.dot_dimension_numbers<[1], [0], [0], [1], [0, 0, 1, 1], [], []>} : vector<16x896xf32>, vector<896x256xf32>, vector<16x256xf32> -> vector<16x256xf32>
    %c0_3 = arith.constant 0 : index
    %c0_4 = arith.constant 0 : index
    %3 = vector.load %arg3[%c0_3, %c0_4] : memref<1x256xf32, #tpu.memory_space<vmem>>, vector<1x256xf32>
    %4 = vector.broadcast %3 : vector<1x256xf32> to vector<16x256xf32>
    %5 = arith.addf %2, %4 : vector<16x256xf32>
    %cst_5 = arith.constant 0.000000e+00 : f32
    %6 = vector.broadcast %cst_5 : f32 to vector<16x256xf32>
    %7 = arith.maximumf %5, %6 : vector<16x256xf32>
    %c0_6 = arith.constant 0 : index
    %c0_7 = arith.constant 0 : index
    %8 = vector.load %arg4[%c0_6, %c0_7] : memref<256x128xf32, #tpu.memory_space<vmem>>, vector<256x128xf32>
    %cst_8 = arith.constant dense<0.000000e+00> : vector<16x128xf32>
    %9 = tpu.matmul %7, %8, %cst_8 {dimension_numbers = #tpu.dot_dimension_numbers<[1], [0], [0], [1], [0, 0, 1, 1], [], []>} : vector<16x256xf32>, vector<256x128xf32>, vector<16x128xf32> -> vector<16x128xf32>
    %c0_9 = arith.constant 0 : index
    %c0_10 = arith.constant 0 : index
    %10 = vector.load %arg5[%c0_9, %c0_10] : memref<1x128xf32, #tpu.memory_space<vmem>>, vector<1x128xf32>
    %11 = vector.broadcast %10 : vector<1x128xf32> to vector<16x128xf32>
    %12 = arith.addf %9, %11 : vector<16x128xf32>
    %cst_11 = arith.constant 0.000000e+00 : f32
    %13 = vector.broadcast %cst_11 : f32 to vector<16x128xf32>
    %14 = arith.maximumf %12, %13 : vector<16x128xf32>
    %c0_12 = arith.constant 0 : index
    %c0_13 = arith.constant 0 : index
    %15 = vector.load %arg6[%c0_12, %c0_13] : memref<128x128xf32, #tpu.memory_space<vmem>>, vector<128x128xf32>
    %cst_14 = arith.constant dense<0.000000e+00> : vector<16x128xf32>
    %16 = tpu.matmul %14, %15, %cst_14 {dimension_numbers = #tpu.dot_dimension_numbers<[1], [0], [0], [1], [0, 0, 1, 1], [], []>} : vector<16x128xf32>, vector<128x128xf32>, vector<16x128xf32> -> vector<16x128xf32>
    %c0_15 = arith.constant 0 : index
    %c0_16 = arith.constant 0 : index
    %17 = vector.load %arg7[%c0_15, %c0_16] : memref<1x128xf32, #tpu.memory_space<vmem>>, vector<1x128xf32>
    %18 = vector.broadcast %17 : vector<1x128xf32> to vector<16x128xf32>
    %19 = arith.addf %16, %18 : vector<16x128xf32>
    %cst_17 = arith.constant 0.000000e+00 : f32
    %20 = vector.broadcast %cst_17 : f32 to vector<16x128xf32>
    %21 = arith.maximumf %19, %20 : vector<16x128xf32>
    %c0_18 = arith.constant 0 : index
    %c0_19 = arith.constant 0 : index
    %22 = vector.load %arg8[%c0_18, %c0_19] : memref<16x128xf32, #tpu.memory_space<vmem>>, vector<16x128xf32>
    tpu.vector_store %arg8[%c0_18, %c0_19], %21 {strides = array<i32>} : memref<16x128xf32, #tpu.memory_space<vmem>>, vector<16x128xf32>,
    return
  }
  func.func @transform_0(%arg0: i32) -> (i32, i32) {
    %c0_i32 = arith.constant 0 : i32
    %c0_i32_0 = arith.constant 0 : i32
    return %arg0, %c0_i32 : i32, i32
  }
  func.func @transform_1(%arg0: i32) -> (i32, i32) {
    %c0_i32 = arith.constant 0 : i32
    %c0_i32_0 = arith.constant 0 : i32
    %c0_i32_1 = arith.constant 0 : i32
    return %c0_i32, %c0_i32_0 : i32, i32
  }
  func.func @transform_2(%arg0: i32) -> (i32, i32) {
    %c0_i32 = arith.constant 0 : i32
    %c0_i32_0 = arith.constant 0 : i32
    %c0_i32_1 = arith.constant 0 : i32
    return %c0_i32, %c0_i32_0 : i32, i32
  }
  func.func @transform_3(%arg0: i32) -> (i32, i32) {
    %c0_i32 = arith.constant 0 : i32
    %c0_i32_0 = arith.constant 0 : i32
    %c0_i32_1 = arith.constant 0 : i32
    return %c0_i32, %c0_i32_0 : i32, i32
  }
  func.func @transform_4(%arg0: i32) -> (i32, i32) {
    %c0_i32 = arith.constant 0 : i32
    %c0_i32_0 = arith.constant 0 : i32
    %c0_i32_1 = arith.constant 0 : i32
    return %c0_i32, %c0_i32_0 : i32, i32
  }
  func.func @transform_5(%arg0: i32) -> (i32, i32) {
    %c0_i32 = arith.constant 0 : i32
    %c0_i32_0 = arith.constant 0 : i32
    %c0_i32_1 = arith.constant 0 : i32
    return %c0_i32, %c0_i32_0 : i32, i32
  }
  func.func @transform_6(%arg0: i32) -> (i32, i32) {
    %c0_i32 = arith.constant 0 : i32
    %c0_i32_0 = arith.constant 0 : i32
    %c0_i32_1 = arith.constant 0 : i32
    return %c0_i32, %c0_i32_0 : i32, i32
  }
  func.func @transform_7(%arg0: i32) -> (i32, i32) {
    %c0_i32 = arith.constant 0 : i32
    %c0_i32_0 = arith.constant 0 : i32
    return %arg0, %c0_i32 : i32, i32
  }
}

</mosaic_0001>

<bundles_post_ra>
// kernel: _lambda_.1
= control target key start
LH: loop header
LB: loop body
LE: loop exit
PB: predicated region body
PF: predicated region fallthrough
CT: control target
= control target key end

     0   :  { %12 = vsyncpa [#allocation3], 0  ;;  %s1182_s0 = inlined_call_operand.vmem [shape: f32[16,896], index: 0, kind: input, shape index: {}]   ;;  %s1183_s1 = inlined_call_operand.hbm [shape: f32[896,256], index: 1, kind: input, shape index: {}]   ;;  %s1184_s2 = inlined_call_operand.vmem [shape: f32[1,256], index: 2, kind: input, shape index: {}]   ;;  %s1185_s3 = inlined_call_operand.hbm [shape: f32[256,128], index: 3, kind: input, shape index: {}]   ;;  %s1186_s4 = inlined_call_operand.vmem [shape: f32[1,128], index: 4, kind: input, shape index: {}]   ;;  %s1187_s5 = inlined_call_operand.vmem [shape: f32[128,128], index: 5, kind: input, shape index: {}]   ;;  %s1188_s6 = inlined_call_operand.vmem [shape: f32[1,128], index: 6, kind: input, shape index: {}]   ;;  %s1189_s7 = inlined_call_operand.hbm [shape: f32[16,128], index: 7, kind: output, shape index: {}]  }
   0x1   :  { %13 = vsyncpa [#allocation6], 0 }
   0x2   :  { %14 = vsyncpa [#allocation4], 0  ;;  %s1020_s24 = smov [#allocation2]  }
   0x3   :  { %s22_s25 = sshll.u32 %s1020_s24, 4  ;;  %s23_s25 = int_to_ptr.vmem [resolvable:$true] %s22_s25 }
   0x4   :  { %s962_s26 = scalar_lea.vmem %s23_s25, 28672  ;;  %p967_p1 = scmp.lt.s32.totalorder %s23_s25, %s23_s25 }
   0x5   :  { %p963_p0 = scmp.ne.s32.totalorder %s23_s25, %s962_s26  ;;  %p968_p2 = scmp.lt.s32.totalorder %s962_s26, %s962_s26 }
   0x7   :  { %p969_p3 = por %p968_p2, %p967_p1 }
   0x9   :  { %p970_p4 = pnand %p969_p3, %p963_p0 }
   0xb   :  { %973 = shalt.err (!%p970_p4)
}
   0xc   :  { %s1021_s27 = smov 256   ;;  %s1022_s28 = smov 16  }
   0xd   :  { %28 = dma.hbm_to_vmem [thread:$0]  %s1183_s1, 28672, %s23_s25, [#allocation3], %s1021_s27, %s1021_s27, %s1022_s28  }
   0xe   :  { %s1023_s8 = smov [#allocation5]  }
   0xf   :  { %s36_s9 = sshll.u32 %s1023_s8, 4  ;;  %s37_s9 = int_to_ptr.vmem [resolvable:$true] %s36_s9 }
  0x10   :  { %s982_s10 = scalar_lea.vmem %s37_s9, 4096  ;;  %p987_p6 = scmp.lt.s32.totalorder %s37_s9, %s37_s9 }
  0x11   :  { %p983_p5 = scmp.ne.s32.totalorder %s37_s9, %s982_s10  ;;  %p988_p7 = scmp.lt.s32.totalorder %s982_s10, %s982_s10 }
  0x13   :  { %p989_p8 = por %p988_p7, %p987_p6 }
  0x15   :  { %p990_p9 = pnand %p989_p8, %p983_p5 }
  0x17   :  { %993 = shalt.err (!%p990_p9)
}
  0x18   :  { %s1024_s11 = smov 128   ;;  %s1025_s12 = smov 8  }
  0x19   :  { %42 = dma.hbm_to_vmem [thread:$0]  %s1185_s3, 4096, %s37_s9, [#allocation6], %s1024_s11, %s1024_s11, %s1025_s12  }
  0x1a   :  { %1014 = dma.done.wait [#allocation3], 28672  }
  0x1b   :  { %1015 = vsyncadd [#allocation3], 4294938624 }
  0x1c   :  { %1016 = dma.done.wait [#allocation6], 4096  }
  0x1d   :  { %1017 = vsyncadd [#allocation6], 4294963200  ;;  %v100_v0 = vld [vmem:[#allocation2 + $0xf8] sm:$0xff]  ;;  %v99_v1 = vld [vmem:[#allocation2 + $0xf0] sm:$0xff]  ;;  %s1027_s29 = smov [#allocation7]  }
  0x1e   :  { %v98_v2 = vld [vmem:[#allocation2 + $0xe8] sm:$0xff]  ;;  %305 = vmatprep.subr.mxu0 %v100_v0  ;;  %v164_v3 = vld [vmem:[#allocation2 + $0x2f8] sm:$0xff]  ;;  %v97_v4 = vld [vmem:[#allocation2 + $0xe0] sm:$0xff] }
  0x1f   :  { %v163_v5 = vld [vmem:[#allocation2 + $0x2f0] sm:$0xff]  ;;  %306 = vmatpush1.msra.mxu0 %v99_v1  ;;  %382 = vmatprep.subr.mxu1 %v164_v3  ;;  %v96_v6 = vld [vmem:[#allocation2 + $0xd8] sm:$0xff]  ;;  %v162_v7 = vld [vmem:[#allocation2 + $0x2e8] sm:$0xff] }
  0x20   :  { %307 = vmatprep.subr.mxu0 %v98_v2  ;;  %383 = vmatpush1.msra.mxu1 %v163_v5  ;;  %v95_v8 = vld [vmem:[#allocation2 + $0xd0] sm:$0xff]  ;;  %v161_v9 = vld [vmem:[#allocation2 + $0x2e0] sm:$0xff]  ;;  %v160_v10 = vld [vmem:[#allocation2 + $0x2d8] sm:$0xff] }
  0x21   :  { %308 = vmatpush1.msra.mxu0 %v97_v4  ;;  %384 = vmatprep.subr.mxu1 %v162_v7  ;;  %v94_v11 = vld [vmem:[#allocation2 + $0xc8] sm:$0xff]  ;;  %v159_v12 = vld [vmem:[#allocation2 + $0x2d0] sm:$0xff]  ;;  %v93_v13 = vld [vmem:[#allocation2 + $0xc0] sm:$0xff] }
  0x22   :  { %309 = vmatprep.subr.mxu0 %v96_v6  ;;  %385 = vmatpush1.msra.mxu1 %v161_v9  ;;  %v158_v14 = vld [vmem:[#allocation2 + $0x2c8] sm:$0xff]  ;;  %v92_v15 = vld [vmem:[#allocation2 + $0xb8] sm:$0xff]  ;;  %v157_v16 = vld [vmem:[#allocation2 + $0x2c0] sm:$0xff] }
  0x23   :  { %310 = vmatpush1.msra.mxu0 %v95_v8  ;;  %386 = vmatprep.subr.mxu1 %v160_v10  ;;  %v91_v17 = vld [vmem:[#allocation2 + $0xb0] sm:$0xff]  ;;  %v156_v18 = vld [vmem:[#allocation2 + $0x2b8] sm:$0xff]  ;;  %v90_v19 = vld [vmem:[#allocation2 + $0xa8] sm:$0xff] }
  0x24   :  { %311 = vmatprep.subr.mxu0 %v94_v11  ;;  %387 = vmatpush1.msra.mxu1 %v159_v12  ;;  %v155_v20 = vld [vmem:[#allocation2 + $0x2b0] sm:$0xff]  ;;  %v89_v21 = vld [vmem:[#allocation2 + $0xa0] sm:$0xff]  ;;  %v154_v22 = vld [vmem:[#allocation2 + $0x2a8] sm:$0xff] }
  0x25   :  { %312 = vmatpush1.msra.mxu0 %v93_v13  ;;  %388 = vmatprep.subr.mxu1 %v158_v14  ;;  %v88_v23 = vld [vmem:[#allocation2 + $0x98] sm:$0xff]  ;;  %v153_v24 = vld [vmem:[#allocation2 + $0x2a0] sm:$0xff]  ;;  %v87_v25 = vld [vmem:[#allocation2 + $0x90] sm:$0xff] }
  0x26   :  { %313 = vmatprep.subr.mxu0 %v92_v15  ;;  %389 = vmatpush1.msra.mxu1 %v157_v16  ;;  %v152_v26 = vld [vmem:[#allocation2 + $0x298] sm:$0xff]  ;;  %v86_v27 = vld [vmem:[#allocation2 + $0x88] sm:$0xff]  ;;  %v151_v28 = vld [vmem:[#allocation2 + $0x290] sm:$0xff] }
  0x27   :  { %314 = vmatpush1.msra.mxu0 %v91_v17  ;;  %390 = vmatprep.subr.mxu1 %v156_v18  ;;  %v85_v29 = vld [vmem:[#allocation2 + $0x80] sm:$0xff]  ;;  %v150_v30 = vld [vmem:[#allocation2 + $0x288] sm:$0xff]  ;;  %v84_v31 = vld [vmem:[#allocation2 + $0x78] sm:$0xff] }
  0x28   :  { %315 = vmatprep.subr.mxu0 %v90_v19  ;;  %391 = vmatpush1.msra.mxu1 %v155_v20  ;;  %v149_v32 = vld [vmem:[#allocation2 + $0x280] sm:$0xff]  ;;  %v83_v33 = vld [vmem:[#allocation2 + $0x70] sm:$0xff]  ;;  %v148_v34 = vld [vmem:[#allocation2 + $0x278] sm:$0xff] }
  0x29   :  { %316 = vmatpush1.msra.mxu0 %v89_v21  ;;  %392 = vmatprep.subr.mxu1 %v154_v22  ;;  %v82_v35 = vld [vmem:[#allocation2 + $0x68] sm:$0xff]  ;;  %v147_v36 = vld [vmem:[#allocation2 + $0x270] sm:$0xff]  ;;  %v81_v37 = vld [vmem:[#allocation2 + $0x60] sm:$0xff] }
  0x2a   :  { %317 = vmatprep.subr.mxu0 %v88_v23  ;;  %393 = vmatpush1.msra.mxu1 %v153_v24  ;;  %v146_v38 = vld [vmem:[#allocation2 + $0x268] sm:$0xff]  ;;  %v80_v39 = vld [vmem:[#allocation2 + $0x58] sm:$0xff]  ;;  %v145_v40 = vld [vmem:[#allocation2 + $0x260] sm:$0xff] }
  0x2b   :  { %318 = vmatpush1.msra.mxu0 %v87_v25  ;;  %394 = vmatprep.subr.mxu1 %v152_v26  ;;  %v79_v41 = vld [vmem:[#allocation2 + $0x50] sm:$0xff]  ;;  %v144_v42 = vld [vmem:[#allocation2 + $0x258] sm:$0xff]  ;;  %v78_v43 = vld [vmem:[#allocation2 + $0x48] sm:$0xff] }
  0x2c   :  { %319 = vmatprep.subr.mxu0 %v86_v27  ;;  %395 = vmatpush1.msra.mxu1 %v151_v28  ;;  %v143_v44 = vld [vmem:[#allocation2 + $0x250] sm:$0xff]  ;;  %v77_v45 = vld [vmem:[#allocation2 + $0x40] sm:$0xff]  ;;  %v142_v46 = vld [vmem:[#allocation2 + $0x248] sm:$0xff] }
  0x2d   :  { %320 = vmatpush1.msra.mxu0 %v85_v29  ;;  %396 = vmatprep.subr.mxu1 %v150_v30  ;;  %v76_v47 = vld [vmem:[#allocation2 + $0x38] sm:$0xff]  ;;  %v141_v48 = vld [vmem:[#allocation2 + $0x240] sm:$0xff]  ;;  %v75_v49 = vld [vmem:[#allocation2 + $0x30] sm:$0xff] }
  0x2e   :  { %321 = vmatprep.subr.mxu0 %v84_v31  ;;  %397 = vmatpush1.msra.mxu1 %v149_v32  ;;  %v140_v50 = vld [vmem:[#allocation2 + $0x238] sm:$0xff]  ;;  %v74_v51 = vld [vmem:[#allocation2 + $0x28] sm:$0xff]  ;;  %v139_v52 = vld [vmem:[#allocation2 + $0x230] sm:$0xff] }
  0x2f   :  { %322 = vmatpush1.msra.mxu0 %v83_v33  ;;  %398 = vmatprep.subr.mxu1 %v148_v34  ;;  %v73_v53 = vld [vmem:[#allocation2 + $0x20] sm:$0xff]  ;;  %v138_v54 = vld [vmem:[#allocation2 + $0x228] sm:$0xff]  ;;  %v72_v55 = vld [vmem:[#allocation2 + $0x18] sm:$0xff] }
  0x30   :  { %323 = vmatprep.subr.mxu0 %v82_v35  ;;  %399 = vmatpush1.msra.mxu1 %v147_v36  ;;  %v137_v56 = vld [vmem:[#allocation2 + $0x220] sm:$0xff]  ;;  %v71_v57 = vld [vmem:[#allocation2 + $0x10] sm:$0xff]  ;;  %v136_v58 = vld [vmem:[#allocation2 + $0x218] sm:$0xff] }
  0x31   :  { %324 = vmatpush1.msra.mxu0 %v81_v37  ;;  %400 = vmatprep.subr.mxu1 %v146_v38  ;;  %v70_v59 = vld [vmem:[#allocation2 + $0x8] sm:$0xff]  ;;  %v135_v60 = vld [vmem:[#allocation2 + $0x210] sm:$0xff]  ;;  %v69_v61 = vld [vmem:[#allocation2] sm:$0xff] }
  0x32   :  { %325 = vmatprep.subr.mxu0 %v80_v39  ;;  %401 = vmatpush1.msra.mxu1 %v145_v40  ;;  %v134_v62 = vld [vmem:[#allocation2 + $0x208] sm:$0xff]  ;;  %v132_v63 = vld [vmem:[#allocation2 + $0x1f8] sm:$0xff]  ;;  %v133_v0 = vld [vmem:[#allocation2 + $0x200] sm:$0xff] }
  0x33   :  { %326 = vmatpush1.msra.mxu0 %v79_v41  ;;  %402 = vmatprep.subr.mxu1 %v144_v42  ;;  %v131_v1 = vld [vmem:[#allocation2 + $0x1f0] sm:$0xff]  ;;  %v196_v2 = vld [vmem:[#allocation2 + $0x3f8] sm:$0xff]  ;;  %v130_v3 = vld [vmem:[#allocation2 + $0x1e8] sm:$0xff] }
  0x34   :  { %327 = vmatprep.subr.mxu0 %v78_v43  ;;  %403 = vmatpush1.msra.mxu1 %v143_v44  ;;  %v195_v4 = vld [vmem:[#allocation2 + $0x3f0] sm:$0xff]  ;;  %v129_v5 = vld [vmem:[#allocation2 + $0x1e0] sm:$0xff]  ;;  %v194_v6 = vld [vmem:[#allocation2 + $0x3e8] sm:$0xff] }
  0x35   :  { %328 = vmatpush1.msra.mxu0 %v77_v45  ;;  %404 = vmatprep.subr.mxu1 %v142_v46  ;;  %v128_v7 = vld [vmem:[#allocation2 + $0x1d8] sm:$0xff]  ;;  %v193_v8 = vld [vmem:[#allocation2 + $0x3e0] sm:$0xff]  ;;  %v127_v9 = vld [vmem:[#allocation2 + $0x1d0] sm:$0xff] }
  0x36   :  { %329 = vmatprep.subr.mxu0 %v76_v47  ;;  %405 = vmatpush1.msra.mxu1 %v141_v48  ;;  %v192_v10 = vld [vmem:[#allocation2 + $0x3d8] sm:$0xff]  ;;  %v126_v11 = vld [vmem:[#allocation2 + $0x1c8] sm:$0xff]  ;;  %v191_v12 = vld [vmem:[#allocation2 + $0x3d0] sm:$0xff] }
  0x37   :  { %330 = vmatpush1.msra.mxu0 %v75_v49  ;;  %406 = vmatprep.subr.mxu1 %v140_v50  ;;  %v125_v13 = vld [vmem:[#allocation2 + $0x1c0] sm:$0xff]  ;;  %v190_v14 = vld [vmem:[#allocation2 + $0x3c8] sm:$0xff]  ;;  %v124_v15 = vld [vmem:[#allocation2 + $0x1b8] sm:$0xff] }
  0x38   :  { %331 = vmatprep.subr.mxu0 %v74_v51  ;;  %407 = vmatpush1.msra.mxu1 %v139_v52  ;;  %v189_v16 = vld [vmem:[#allocation2 + $0x3c0] sm:$0xff]  ;;  %v123_v17 = vld [vmem:[#allocation2 + $0x1b0] sm:$0xff]  ;;  %v188_v18 = vld [vmem:[#allocation2 + $0x3b8] sm:$0xff] }
  0x39   :  { %332 = vmatpush1.msra.mxu0 %v73_v53  ;;  %408 = vmatprep.subr.mxu1 %v138_v54  ;;  %v122_v19 = vld [vmem:[#allocation2 + $0x1a8] sm:$0xff]  ;;  %v187_v20 = vld [vmem:[#allocation2 + $0x3b0] sm:$0xff]  ;;  %v121_v21 = vld [vmem:[#allocation2 + $0x1a0] sm:$0xff] }
  0x3a   :  { %333 = vmatprep.subr.mxu0 %v72_v55  ;;  %409 = vmatpush1.msra.mxu1 %v137_v56  ;;  %v186_v22 = vld [vmem:[#allocation2 + $0x3a8] sm:$0xff]  ;;  %v120_v23 = vld [vmem:[#allocation2 + $0x198] sm:$0xff]  ;;  %v185_v24 = vld [vmem:[#allocation2 + $0x3a0] sm:$0xff] }
  0x3b   :  { %334 = vmatpush1.msra.mxu0 %v71_v57  ;;  %410 = vmatprep.subr.mxu1 %v136_v58  ;;  %v119_v25 = vld [vmem:[#allocation2 + $0x190] sm:$0xff]  ;;  %v184_v26 = vld [vmem:[#allocation2 + $0x398] sm:$0xff]  ;;  %v118_v27 = vld [vmem:[#allocation2 + $0x188] sm:$0xff] }
  0x3c   :  { %335 = vmatprep.subr.mxu0 %v70_v59  ;;  %411 = vmatpush1.msra.mxu1 %v135_v60  ;;  %v183_v28 = vld [vmem:[#allocation2 + $0x390] sm:$0xff]  ;;  %v117_v29 = vld [vmem:[#allocation2 + $0x180] sm:$0xff]  ;;  %v182_v30 = vld [vmem:[#allocation2 + $0x388] sm:$0xff] }
  0x3d   :  { %336 = vmatpush1.msra.mxu0 %v69_v61  ;;  %412 = vmatprep.subr.mxu1 %v134_v62  ;;  %v116_v31 = vld [vmem:[#allocation2 + $0x178] sm:$0xff]  ;;  %v181_v32 = vld [vmem:[#allocation2 + $0x380] sm:$0xff]  ;;  %v115_v33 = vld [vmem:[#allocation2 + $0x170] sm:$0xff] }
  0x3e   :  { %337 = vmatprep.subr.mxu0 %v132_v63  ;;  %413 = vmatpush1.msra.mxu1 %v133_v0  ;;  %v180_v34 = vld [vmem:[#allocation2 + $0x378] sm:$0xff]  ;;  %v114_v35 = vld [vmem:[#allocation2 + $0x168] sm:$0xff]  ;;  %v179_v36 = vld [vmem:[#allocation2 + $0x370] sm:$0xff] }
  0x3f   :  { %338 = vmatpush2.msra.mxu0 %v131_v1  ;;  %414 = vmatprep.subr.mxu1 %v196_v2  ;;  %v113_v37 = vld [vmem:[#allocation2 + $0x160] sm:$0xff]  ;;  %v178_v38 = vld [vmem:[#allocation2 + $0x368] sm:$0xff]  ;;  %v112_v39 = vld [vmem:[#allocation2 + $0x158] sm:$0xff] }
  0x40   :  { %339 = vmatprep.subr.mxu0 %v130_v3  ;;  %415 = vmatpush2.msra.mxu1 %v195_v4  ;;  %v177_v40 = vld [vmem:[#allocation2 + $0x360] sm:$0xff]  ;;  %v111_v41 = vld [vmem:[#allocation2 + $0x150] sm:$0xff]  ;;  %v176_v42 = vld [vmem:[#allocation2 + $0x358] sm:$0xff] }
  0x41   :  { %340 = vmatpush2.msra.mxu0 %v129_v5  ;;  %416 = vmatprep.subr.mxu1 %v194_v6  ;;  %v110_v43 = vld [vmem:[#allocation2 + $0x148] sm:$0xff]  ;;  %v175_v44 = vld [vmem:[#allocation2 + $0x350] sm:$0xff]  ;;  %v109_v45 = vld [vmem:[#allocation2 + $0x140] sm:$0xff] }
  0x42   :  { %341 = vmatprep.subr.mxu0 %v128_v7  ;;  %417 = vmatpush2.msra.mxu1 %v193_v8  ;;  %v174_v46 = vld [vmem:[#allocation2 + $0x348] sm:$0xff]  ;;  %v108_v47 = vld [vmem:[#allocation2 + $0x138] sm:$0xff]  ;;  %v173_v48 = vld [vmem:[#allocation2 + $0x340] sm:$0xff] }
  0x43   :  { %342 = vmatpush2.msra.mxu0 %v127_v9  ;;  %418 = vmatprep.subr.mxu1 %v192_v10  ;;  %v107_v49 = vld [vmem:[#allocation2 + $0x130] sm:$0xff]  ;;  %v172_v50 = vld [vmem:[#allocation2 + $0x338] sm:$0xff]  ;;  %v106_v51 = vld [vmem:[#allocation2 + $0x128] sm:$0xff] }
  0x44   :  { %343 = vmatprep.subr.mxu0 %v126_v11  ;;  %419 = vmatpush2.msra.mxu1 %v191_v12  ;;  %v171_v52 = vld [vmem:[#allocation2 + $0x330] sm:$0xff]  ;;  %v105_v53 = vld [vmem:[#allocation2 + $0x120] sm:$0xff]  ;;  %v170_v54 = vld [vmem:[#allocation2 + $0x328] sm:$0xff] }
  0x45   :  { %344 = vmatpush2.msra.mxu0 %v125_v13  ;;  %420 = vmatprep.subr.mxu1 %v190_v14  ;;  %v104_v55 = vld [vmem:[#allocation2 + $0x118] sm:$0xff]  ;;  %v169_v56 = vld [vmem:[#allocation2 + $0x320] sm:$0xff]  ;;  %v103_v57 = vld [vmem:[#allocation2 + $0x110] sm:$0xff] }
  0x46   :  { %345 = vmatprep.subr.mxu0 %v124_v15  ;;  %421 = vmatpush2.msra.mxu1 %v189_v16  ;;  %v168_v58 = vld [vmem:[#allocation2 + $0x318] sm:$0xff]  ;;  %v102_v59 = vld [vmem:[#allocation2 + $0x108] sm:$0xff]  ;;  %v101_v61 = vld [vmem:[#allocation2 + $0x100] sm:$0xff] }
  0x47   :  { %346 = vmatpush2.msra.mxu0 %v123_v17  ;;  %422 = vmatprep.subr.mxu1 %v188_v18  ;;  %v56_v60 = vld [vmem:[%s1182_s0 + $0x8] sm:$0xff]  ;;  %v167_v62 = vld [vmem:[#allocation2 + $0x310] sm:$0xff]  ;;  %v55_v63 = vld [vmem:[%s1182_s0] sm:$0xff] }
  0x48   :  { %347 = vmatprep.subr.mxu0 %v122_v19  ;;  %423 = vmatpush2.msra.mxu1 %v187_v20  ;;  %v166_v0 = vld [vmem:[#allocation2 + $0x308] sm:$0xff]  ;;  %v228_v1 = vld [vmem:[#allocation2 + $0x4f8] sm:$0xff]  ;;  %v165_v2 = vld [vmem:[#allocation2 + $0x300] sm:$0xff] }
  0x49   :  { %348 = vmatpush2.msra.mxu0 %v121_v21  ;;  %424 = vmatprep.subr.mxu1 %v186_v22  ;;  %v58_v3 = vld [vmem:[%s1182_s0 + $0x18] sm:$0xff]  ;;  %v227_v4 = vld [vmem:[#allocation2 + $0x4f0] sm:$0xff]  ;;  %v226_v6 = vld [vmem:[#allocation2 + $0x4e8] sm:$0xff] }
  0x4a   :  { %349 = vmatprep.subr.mxu0 %v120_v23  ;;  %425 = vmatpush2.msra.mxu1 %v185_v24  ;;  %v57_v5 = vld [vmem:[%s1182_s0 + $0x10] sm:$0xff]  ;;  %v225_v7 = vld [vmem:[#allocation2 + $0x4e0] sm:$0xff]  ;;  %v292_v8 = vld [vmem:[#allocation2 + $0x6f8] sm:$0xff] }
  0x4b   :  { %350 = vmatpush2.msra.mxu0 %v119_v25  ;;  %426 = vmatprep.subr.mxu1 %v184_v26  ;;  %v224_v9 = vld [vmem:[#allocation2 + $0x4d8] sm:$0xff]  ;;  %v291_v10 = vld [vmem:[#allocation2 + $0x6f0] sm:$0xff]  ;;  %v290_v12 = vld [vmem:[#allocation2 + $0x6e8] sm:$0xff] }
  0x4c   :  { %351 = vmatprep.subr.mxu0 %v118_v27  ;;  %427 = vmatpush2.msra.mxu1 %v183_v28  ;;  %v223_v11 = vld [vmem:[#allocation2 + $0x4d0] sm:$0xff]  ;;  %v222_v13 = vld [vmem:[#allocation2 + $0x4c8] sm:$0xff]  ;;  %v289_v14 = vld [vmem:[#allocation2 + $0x6e0] sm:$0xff] }
  0x4d   :  { %352 = vmatpush2.msra.mxu0 %v117_v29  ;;  %428 = vmatprep.subr.mxu1 %v182_v30  ;;  %v221_v15 = vld [vmem:[#allocation2 + $0x4c0] sm:$0xff]  ;;  %v288_v16 = vld [vmem:[#allocation2 + $0x6d8] sm:$0xff]  ;;  %v287_v18 = vld [vmem:[#allocation2 + $0x6d0] sm:$0xff] }
  0x4e   :  { %353 = vmatprep.subr.mxu0 %v116_v31  ;;  %429 = vmatpush2.msra.mxu1 %v181_v32  ;;  %v220_v17 = vld [vmem:[#allocation2 + $0x4b8] sm:$0xff]  ;;  %v219_v19 = vld [vmem:[#allocation2 + $0x4b0] sm:$0xff]  ;;  %v286_v20 = vld [vmem:[#allocation2 + $0x6c8] sm:$0xff] }
  0x4f   :  { %354 = vmatpush2.msra.mxu0 %v115_v33  ;;  %430 = vmatprep.subr.mxu1 %v180_v34  ;;  %v218_v21 = vld [vmem:[#allocation2 + $0x4a8] sm:$0xff]  ;;  %v285_v22 = vld [vmem:[#allocation2 + $0x6c0] sm:$0xff]  ;;  %v284_v24 = vld [vmem:[#allocation2 + $0x6b8] sm:$0xff] }
  0x50   :  { %355 = vmatprep.subr.mxu0 %v114_v35  ;;  %431 = vmatpush2.msra.mxu1 %v179_v36  ;;  %v217_v23 = vld [vmem:[#allocation2 + $0x4a0] sm:$0xff]  ;;  %v216_v25 = vld [vmem:[#allocation2 + $0x498] sm:$0xff]  ;;  %v283_v26 = vld [vmem:[#allocation2 + $0x6b0] sm:$0xff] }
  0x51   :  { %356 = vmatpush2.msra.mxu0 %v113_v37  ;;  %432 = vmatprep.subr.mxu1 %v178_v38  ;;  %v215_v27 = vld [vmem:[#allocation2 + $0x490] sm:$0xff]  ;;  %v282_v28 = vld [vmem:[#allocation2 + $0x6a8] sm:$0xff]  ;;  %v281_v30 = vld [vmem:[#allocation2 + $0x6a0] sm:$0xff] }
  0x52   :  { %357 = vmatprep.subr.mxu0 %v112_v39  ;;  %433 = vmatpush2.msra.mxu1 %v177_v40  ;;  %v214_v29 = vld [vmem:[#allocation2 + $0x488] sm:$0xff]  ;;  %v213_v31 = vld [vmem:[#allocation2 + $0x480] sm:$0xff]  ;;  %v280_v32 = vld [vmem:[#allocation2 + $0x698] sm:$0xff] }
  0x53   :  { %358 = vmatpush2.msra.mxu0 %v111_v41  ;;  %434 = vmatprep.subr.mxu1 %v176_v42  ;;  %v212_v33 = vld [vmem:[#allocation2 + $0x478] sm:$0xff]  ;;  %v279_v34 = vld [vmem:[#allocation2 + $0x690] sm:$0xff]  ;;  %v278_v36 = vld [vmem:[#allocation2 + $0x688] sm:$0xff] }
  0x54   :  { %359 = vmatprep.subr.mxu0 %v110_v43  ;;  %435 = vmatpush2.msra.mxu1 %v175_v44  ;;  %v211_v35 = vld [vmem:[#allocation2 + $0x470] sm:$0xff]  ;;  %v210_v37 = vld [vmem:[#allocation2 + $0x468] sm:$0xff]  ;;  %v277_v38 = vld [vmem:[#allocation2 + $0x680] sm:$0xff] }
  0x55   :  { %360 = vmatpush2.msra.mxu0 %v109_v45  ;;  %436 = vmatprep.subr.mxu1 %v174_v46  ;;  %v209_v39 = vld [vmem:[#allocation2 + $0x460] sm:$0xff]  ;;  %v276_v40 = vld [vmem:[#allocation2 + $0x678] sm:$0xff]  ;;  %v275_v42 = vld [vmem:[#allocation2 + $0x670] sm:$0xff] }
  0x56   :  { %361 = vmatprep.subr.mxu0 %v108_v47  ;;  %437 = vmatpush2.msra.mxu1 %v173_v48  ;;  %v208_v41 = vld [vmem:[#allocation2 + $0x458] sm:$0xff]  ;;  %v207_v43 = vld [vmem:[#allocation2 + $0x450] sm:$0xff]  ;;  %v274_v44 = vld [vmem:[#allocation2 + $0x668] sm:$0xff] }
  0x57   :  { %362 = vmatpush2.msra.mxu0 %v107_v49  ;;  %438 = vmatprep.subr.mxu1 %v172_v50  ;;  %v206_v45 = vld [vmem:[#allocation2 + $0x448] sm:$0xff]  ;;  %v273_v46 = vld [vmem:[#allocation2 + $0x660] sm:$0xff]  ;;  %v272_v48 = vld [vmem:[#allocation2 + $0x658] sm:$0xff] }
  0x58   :  { %363 = vmatprep.subr.mxu0 %v106_v51  ;;  %439 = vmatpush2.msra.mxu1 %v171_v52  ;;  %v205_v47 = vld [vmem:[#allocation2 + $0x440] sm:$0xff]  ;;  %v204_v49 = vld [vmem:[#allocation2 + $0x438] sm:$0xff]  ;;  %v271_v50 = vld [vmem:[#allocation2 + $0x650] sm:$0xff] }
  0x59   :  { %364 = vmatpush2.msra.mxu0 %v105_v53  ;;  %440 = vmatprep.subr.mxu1 %v170_v54  ;;  %v203_v51 = vld [vmem:[#allocation2 + $0x430] sm:$0xff]  ;;  %v270_v52 = vld [vmem:[#allocation2 + $0x648] sm:$0xff]  ;;  %v269_v54 = vld [vmem:[#allocation2 + $0x640] sm:$0xff] }
  0x5a   :  { %365 = vmatprep.subr.mxu0 %v104_v55  ;;  %441 = vmatpush2.msra.mxu1 %v169_v56  ;;  %v202_v53 = vld [vmem:[#allocation2 + $0x428] sm:$0xff]  ;;  %v201_v55 = vld [vmem:[#allocation2 + $0x420] sm:$0xff]  ;;  %v268_v56 = vld [vmem:[#allocation2 + $0x638] sm:$0xff] }
  0x5b   :  { %366 = vmatpush2.msra.mxu0 %v103_v57  ;;  %442 = vmatprep.subr.mxu1 %v168_v58  ;;  %v200_v57 = vld [vmem:[#allocation2 + $0x418] sm:$0xff]  ;;  %v63_v58 = vld [vmem:[%s1182_s0 + $0x40] sm:$0xff] }
  0x5c   :  { %367 = vmatprep.subr.mxu0 %v102_v59  ;;  %369 = vmatprep.mubr.f32.mxu0 %v56_v60  ;;  %v199_v59 = vld [vmem:[#allocation2 + $0x410] sm:$0xff] }
  0x5d   :  { %368 = vmatpush2.msra.mxu0 %v101_v61  ;;  %443 = vmatpush2.msra.mxu1 %v167_v62  ;;  %v267_v60 = vld [vmem:[#allocation2 + $0x630] sm:$0xff]  ;;  %v198_v61 = vld [vmem:[#allocation2 + $0x408] sm:$0xff]  ;;  %v62_v62 = vld [vmem:[%s1182_s0 + $0x38] sm:$0xff] }
  0x5e   :  { %370 = vmatmul.mubr.f32.vlgmr.msra.gmra.mxu0 %v55_v63  ;;  %444 = vmatprep.subr.mxu1 %v166_v0  ;;  %v197_v63 = vld [vmem:[#allocation2 + $0x400] sm:$0xff]  ;;  %v266_v0 = vld [vmem:[#allocation2 + $0x628] sm:$0xff] }
  0x5f   :  { %459 = vmatprep.subr.mxu0 %v228_v1  ;;  %445 = vmatpush2.msra.mxu1 %v165_v2  ;;  %v260_v1 = vld [vmem:[#allocation2 + $0x5f8] sm:$0xff]  ;;  %v65_v2 = vld [vmem:[%s1182_s0 + $0x50] sm:$0xff] }
  0x60   :  { %446 = vmatprep.mubr.f32.mxu1 %v58_v3  ;;  %460 = vmatpush1.msra.mxu0 %v227_v4  ;;  %v259_v3 = vld [vmem:[#allocation2 + $0x5f0] sm:$0xff]  ;;  %v265_v4 = vld [vmem:[#allocation2 + $0x620] sm:$0xff] }
  0x61   :  { %447 = vmatmul.mubr.f32.vlgmr.msra.gmra.mxu1 %v57_v5  ;;  %461 = vmatprep.subr.mxu0 %v226_v6  ;;  %v258_v5 = vld [vmem:[#allocation2 + $0x5e8] sm:$0xff] }
  0x62   :  { %462 = vmatpush1.msra.mxu0 %v225_v7  ;;  %536 = vmatprep.subr.mxu1 %v292_v8  ;;  %v64_v6 = vld [vmem:[%s1182_s0 + $0x48] sm:$0xff]  ;;  %v257_v7 = vld [vmem:[#allocation2 + $0x5e0] sm:$0xff]  ;;  %v264_v8 = vld [vmem:[#allocation2 + $0x618] sm:$0xff] }
  0x63   :  { %463 = vmatprep.subr.mxu0 %v224_v9  ;;  %537 = vmatpush1.msra.mxu1 %v291_v10  ;;  %v256_v9 = vld [vmem:[#allocation2 + $0x5d8] sm:$0xff]  ;;  %v263_v10 = vld [vmem:[#allocation2 + $0x610] sm:$0xff] }
  0x64   :  { %464 = vmatpush1.msra.mxu0 %v223_v11  ;;  %538 = vmatprep.subr.mxu1 %v290_v12  ;;  %v255_v11 = vld [vmem:[#allocation2 + $0x5d0] sm:$0xff]  ;;  %v262_v12 = vld [vmem:[#allocation2 + $0x608] sm:$0xff] }
  0x65   :  { %465 = vmatprep.subr.mxu0 %v222_v13  ;;  %539 = vmatpush1.msra.mxu1 %v289_v14  ;;  %v254_v13 = vld [vmem:[#allocation2 + $0x5c8] sm:$0xff] }
  0x66   :  { %466 = vmatpush1.msra.mxu0 %v221_v15  ;;  %540 = vmatprep.subr.mxu1 %v288_v16  ;;  %v60_v14 = vld [vmem:[%s1182_s0 + $0x28] sm:$0xff]  ;;  %v253_v15 = vld [vmem:[#allocation2 + $0x5c0] sm:$0xff] }
  0x67   :  { %467 = vmatprep.subr.mxu0 %v220_v17  ;;  %541 = vmatpush1.msra.mxu1 %v287_v18  ;;  %v261_v16 = vld [vmem:[#allocation2 + $0x600] sm:$0xff]  ;;  %v252_v17 = vld [vmem:[#allocation2 + $0x5b8] sm:$0xff]  ;;  %v251_v18 = vld [vmem:[#allocation2 + $0x5b0] sm:$0xff] }
  0x68   :  { %468 = vmatpush1.msra.mxu0 %v219_v19  ;;  %542 = vmatprep.subr.mxu1 %v286_v20  ;;  %v61_v19 = vld [vmem:[%s1182_s0 + $0x30] sm:$0xff]  ;;  %v250_v20 = vld [vmem:[#allocation2 + $0x5a8] sm:$0xff] }
  0x69   :  { %469 = vmatprep.subr.mxu0 %v218_v21  ;;  %543 = vmatpush1.msra.mxu1 %v285_v22  ;;  %v249_v21 = vld [vmem:[#allocation2 + $0x5a0] sm:$0xff]  ;;  %v1026_v22 = vmov 0.0  }
  0x6a   :  { %470 = vmatpush1.msra.mxu0 %v217_v23  ;;  %544 = vmatprep.subr.mxu1 %v284_v24  ;;  %v248_v23 = vld [vmem:[#allocation2 + $0x598] sm:$0xff]  ;;  %v247_v24 = vld [vmem:[#allocation2 + $0x590] sm:$0xff] }
  0x6b   :  { %471 = vmatprep.subr.mxu0 %v216_v25  ;;  %545 = vmatpush1.msra.mxu1 %v283_v26  ;;  %v68_v25 = vld [vmem:[%s1182_s0 + $0x68] sm:$0xff] }
  0x6c   :  { %472 = vmatpush1.msra.mxu0 %v215_v27  ;;  %546 = vmatprep.subr.mxu1 %v282_v28  ;;  %v246_v26 = vld [vmem:[#allocation2 + $0x588] sm:$0xff]  ;;  %v245_v27 = vld [vmem:[#allocation2 + $0x580] sm:$0xff]  ;;  %v244_v28 = vld [vmem:[#allocation2 + $0x578] sm:$0xff] }
  0x6d   :  { %473 = vmatprep.subr.mxu0 %v214_v29  ;;  %547 = vmatpush1.msra.mxu1 %v281_v30  ;;  %v243_v29 = vld [vmem:[#allocation2 + $0x570] sm:$0xff]  ;;  %v242_v30 = vld [vmem:[#allocation2 + $0x568] sm:$0xff] }
  0x6e   :  { %474 = vmatpush1.msra.mxu0 %v213_v31  ;;  %548 = vmatprep.subr.mxu1 %v280_v32  ;;  %v241_v31 = vld [vmem:[#allocation2 + $0x560] sm:$0xff]  ;;  %v240_v32 = vld [vmem:[#allocation2 + $0x558] sm:$0xff] }
  0x6f   :  { %475 = vmatprep.subr.mxu0 %v212_v33  ;;  %549 = vmatpush1.msra.mxu1 %v279_v34  ;;  %v239_v33 = vld [vmem:[#allocation2 + $0x550] sm:$0xff]  ;;  %v238_v34 = vld [vmem:[#allocation2 + $0x548] sm:$0xff] }
  0x70   :  { %476 = vmatpush1.msra.mxu0 %v211_v35  ;;  %550 = vmatprep.subr.mxu1 %v278_v36  ;;  %v237_v35 = vld [vmem:[#allocation2 + $0x540] sm:$0xff]  ;;  %v236_v36 = vld [vmem:[#allocation2 + $0x538] sm:$0xff] }
  0x71   :  { %477 = vmatprep.subr.mxu0 %v210_v37  ;;  %551 = vmatpush1.msra.mxu1 %v277_v38  ;;  %v235_v37 = vld [vmem:[#allocation2 + $0x530] sm:$0xff]  ;;  %v234_v38 = vld [vmem:[#allocation2 + $0x528] sm:$0xff] }
  0x72   :  { %478 = vmatpush1.msra.mxu0 %v209_v39  ;;  %552 = vmatprep.subr.mxu1 %v276_v40  ;;  %v233_v39 = vld [vmem:[#allocation2 + $0x520] sm:$0xff]  ;;  %v232_v40 = vld [vmem:[#allocation2 + $0x518] sm:$0xff] }
  0x73   :  { %479 = vmatprep.subr.mxu0 %v208_v41  ;;  %553 = vmatpush1.msra.mxu1 %v275_v42  ;;  %v231_v41 = vld [vmem:[#allocation2 + $0x510] sm:$0xff]  ;;  %v230_v42 = vld [vmem:[#allocation2 + $0x508] sm:$0xff] }
  0x74   :  { %480 = vmatpush1.msra.mxu0 %v207_v43  ;;  %554 = vmatprep.subr.mxu1 %v274_v44  ;;  %v229_v43 = vld [vmem:[#allocation2 + $0x500] sm:$0xff] }
  0x75   :  { %481 = vmatprep.subr.mxu0 %v206_v45  ;;  %555 = vmatpush1.msra.mxu1 %v273_v46  ;;  %v59_v44 = vld [vmem:[%s1182_s0 + $0x20] sm:$0xff]  ;;  %v66_v46 = vld [vmem:[%s1182_s0 + $0x58] sm:$0xff] }
  0x76   :  { %482 = vmatpush1.msra.mxu0 %v205_v47  ;;  %556 = vmatprep.subr.mxu1 %v272_v48  ;;  %v67_v45 = vld [vmem:[%s1182_s0 + $0x60] sm:$0xff]  ;;  %v648_v47 = vld [vmem:[#allocation5 + $0xf8] sm:$0xff] }
  0x77   :  { %483 = vmatprep.subr.mxu0 %v204_v49  ;;  %557 = vmatpush1.msra.mxu1 %v271_v50  ;;  %v632_v48 = vld [vmem:[#allocation5 + $0x78] sm:$0xff]  ;;  %v647_v49 = vld [vmem:[#allocation5 + $0xf0] sm:$0xff] }
  0x78   :  { %484 = vmatpush1.msra.mxu0 %v203_v51  ;;  %558 = vmatprep.subr.mxu1 %v270_v52  ;;  %v631_v50 = vld [vmem:[#allocation5 + $0x70] sm:$0xff]  ;;  %v646_v51 = vld [vmem:[#allocation5 + $0xe8] sm:$0xff] }
  0x79   :  { %485 = vmatprep.subr.mxu0 %v202_v53  ;;  %559 = vmatpush1.msra.mxu1 %v269_v54  ;;  %v630_v52 = vld [vmem:[#allocation5 + $0x68] sm:$0xff]  ;;  %v645_v53 = vld [vmem:[#allocation5 + $0xe0] sm:$0xff] }
  0x7a   :  { %486 = vmatpush1.msra.mxu0 %v201_v55  ;;  %560 = vmatprep.subr.mxu1 %v268_v56  ;;  %v629_v54 = vld [vmem:[#allocation5 + $0x60] sm:$0xff]  ;;  %v644_v55 = vld [vmem:[#allocation5 + $0xd8] sm:$0xff] }
  0x7b   :  { %487 = vmatprep.subr.mxu0 %v200_v57  ;;  %375 = vmatprep.mubr.f32.mxu0 %v63_v58  ;;  %v628_v56 = vld [vmem:[#allocation5 + $0x58] sm:$0xff]  ;;  %v643_v57 = vld [vmem:[#allocation5 + $0xd0] sm:$0xff] }
  0x7c   :  { %488 = vmatpush1.msra.mxu0 %v199_v59  ;;  %561 = vmatpush1.msra.mxu1 %v267_v60  ;;  %v627_v58 = vld [vmem:[#allocation5 + $0x50] sm:$0xff]  ;;  %v642_v59 = vld [vmem:[#allocation5 + $0xc8] sm:$0xff] }
  0x7d   :  { %489 = vmatprep.subr.mxu0 %v198_v61  ;;  %376 = vmatmul.mubr.f32.gmra.mxu0 %v62_v62  ;;  %v626_v60 = vld [vmem:[#allocation5 + $0x48] sm:$0xff]  ;;  %v641_v61 = vld [vmem:[#allocation5 + $0xc0] sm:$0xff] }
  0x7e   :  { %490 = vmatpush1.msra.mxu0 %v197_v63  ;;  %562 = vmatprep.subr.mxu1 %v266_v0  ;;  %v625_v62 = vld [vmem:[#allocation5 + $0x40] sm:$0xff]  ;;  %v640_v63 = vld [vmem:[#allocation5 + $0xb8] sm:$0xff] }
  0x7f   :  { %491 = vmatprep.subr.mxu0 %v260_v1  ;;  %452 = vmatprep.mubr.f32.mxu1 %v65_v2  ;;  %v624_v0 = vld [vmem:[#allocation5 + $0x38] sm:$0xff]  ;;  %v639_v1 = vld [vmem:[#allocation5 + $0xb0] sm:$0xff] }
  0x80   :  { %492 = vmatpush2.msra.mxu0 %v259_v3  ;;  %563 = vmatpush1.msra.mxu1 %v265_v4  ;;  %v623_v2 = vld [vmem:[#allocation5 + $0x30] sm:$0xff]  ;;  %v638_v3 = vld [vmem:[#allocation5 + $0xa8] sm:$0xff] }
  0x81   :  { %493 = vmatprep.subr.mxu0 %v258_v5  ;;  %453 = vmatmul.mubr.f32.gmra.mxu1 %v64_v6  ;;  %v622_v4 = vld [vmem:[#allocation5 + $0x28] sm:$0xff]  ;;  %v637_v5 = vld [vmem:[#allocation5 + $0xa0] sm:$0xff] }
  0x82   :  { %494 = vmatpush2.msra.mxu0 %v257_v7  ;;  %564 = vmatprep.subr.mxu1 %v264_v8  ;;  %v621_v6 = vld [vmem:[#allocation5 + $0x20] sm:$0xff]  ;;  %v636_v7 = vld [vmem:[#allocation5 + $0x98] sm:$0xff] }
  0x83   :  { %495 = vmatprep.subr.mxu0 %v256_v9  ;;  %565 = vmatpush1.msra.mxu1 %v263_v10  ;;  %v620_v8 = vld [vmem:[#allocation5 + $0x18] sm:$0xff]  ;;  %v635_v9 = vld [vmem:[#allocation5 + $0x90] sm:$0xff] }
  0x84   :  { %496 = vmatpush2.msra.mxu0 %v255_v11  ;;  %566 = vmatprep.subr.mxu1 %v262_v12  ;;  %v619_v10 = vld [vmem:[#allocation5 + $0x10] sm:$0xff]  ;;  %v634_v11 = vld [vmem:[#allocation5 + $0x88] sm:$0xff] }
  0x85   :  { %497 = vmatprep.subr.mxu0 %v254_v13  ;;  %523 = vmatprep.mubr.f32.mxu0 %v60_v14  ;;  %v618_v12 = vld [vmem:[#allocation5 + $0x8] sm:$0xff]  ;;  %v633_v13 = vld [vmem:[#allocation5 + $0x80] sm:$0xff] }
  0x86   :  { %498 = vmatpush2.msra.mxu0 %v253_v15  ;;  %567 = vmatpush1.msra.mxu1 %v261_v16  ;;  %v617_v14 = vld [vmem:[#allocation5] sm:$0xff]  ;;  %v748_v15 = vld [vmem:[%s1187_s5 + $0x78] sm:$0xff]  ;;  %v747_v16 = vld [vmem:[%s1187_s5 + $0x70] sm:$0xff] }
  0x87   :  { %499 = vmatprep.subr.mxu0 %v252_v17  ;;  %600 = vmatprep.mubr.f32.mxu1 %v1026_v22  ;;  %v746_v17 = vld [vmem:[%s1187_s5 + $0x68] sm:$0xff] }
  0x88   :  { %500 = vmatpush2.msra.mxu0 %v251_v18  ;;  %601 = vmatmul.mubr.f32.vlgmr.msra.gmra.mxu1 %v61_v19  ;;  %v745_v18 = vld [vmem:[%s1187_s5 + $0x60] sm:$0xff]  ;;  %v744_v19 = vld [vmem:[%s1187_s5 + $0x58] sm:$0xff] }
  0x89   :  { %501 = vmatprep.subr.mxu0 %v250_v20  ;;  %606 = vmatprep.mubr.f32.mxu1 %v1026_v22  ;;  %v743_v20 = vld [vmem:[%s1187_s5 + $0x50] sm:$0xff]  ;;  %v741_v22 = vld [vmem:[%s1187_s5 + $0x40] sm:$0xff] }
  0x8a   :  { %502 = vmatpush2.msra.mxu0 %v249_v21  ;;  %855 = vmatprep.subr.mxu1 %v648_v47  ;;  %v742_v21 = vld [vmem:[%s1187_s5 + $0x48] sm:$0xff] }
  0x8b   :  { %503 = vmatprep.subr.mxu0 %v248_v23  ;;  %856 = vmatpush3.msra.mxu1 %v632_v48  ;;  %v740_v23 = vld [vmem:[%s1187_s5 + $0x38] sm:$0xff] }
  0x8c   :  { %504 = vmatpush2.msra.mxu0 %v247_v24  ;;  %607 = vmatmul.mubr.f32.gmra.mxu1 %v68_v25  ;;  %v739_v24 = vld [vmem:[%s1187_s5 + $0x30] sm:$0xff]  ;;  %v295_v25 = vlaneseq }
  0x8d   :  { %505 = vmatprep.subr.mxu0 %v246_v26  ;;  %857 = vmatprep.subr.mxu1 %v647_v49 }
  0x8e   :  { %506 = vmatpush2.msra.mxu0 %v245_v27  ;;  %858 = vmatpush3.msra.mxu1 %v631_v50  ;;  %v296_v27 = vshrl.u32 %v295_v25, 7 }
  0x8f   :  { %507 = vmatprep.subr.mxu0 %v244_v28  ;;  %859 = vmatprep.subr.mxu1 %v646_v51 }
  0x90   :  { %508 = vmatpush2.msra.mxu0 %v243_v29  ;;  %860 = vmatpush3.msra.mxu1 %v630_v52  ;;  %v297_v29 = vsub.s32 0, %v296_v27 }
  0x91   :  { %509 = vmatprep.subr.mxu0 %v242_v30  ;;  %861 = vmatprep.subr.mxu1 %v645_v53  ;;  %v293_v30 = vld [vmem:[%s1184_s2] sm:$0x3] }
  0x92   :  { %510 = vmatpush2.msra.mxu0 %v241_v31  ;;  %862 = vmatpush3.msra.mxu1 %v629_v54 }
  0x93   :  { %511 = vmatprep.subr.mxu0 %v240_v32  ;;  %863 = vmatprep.subr.mxu1 %v644_v55 }
  0x94   :  { %512 = vmatpush2.msra.mxu0 %v239_v33  ;;  %864 = vmatpush3.msra.mxu1 %v628_v56  ;;  %v301_v33 = vsub.s32 1, %v296_v27 }
  0x95   :  { %513 = vmatprep.subr.mxu0 %v238_v34  ;;  %865 = vmatprep.subr.mxu1 %v643_v57  ;;  %v298_v34 = vrot.slane %v293_v30, %v297_v29 }
  0x96   :  { %514 = vmatpush2.msra.mxu0 %v237_v35  ;;  %866 = vmatpush3.msra.mxu1 %v627_v58 }
  0x97   :  { %515 = vmatprep.subr.mxu0 %v236_v36  ;;  %867 = vmatprep.subr.mxu1 %v642_v59 }
  0x98   :  { %516 = vmatpush2.msra.mxu0 %v235_v37  ;;  %868 = vmatpush3.msra.mxu1 %v626_v60  ;;  %v302_v37 = vrot.slane %v293_v30, %v301_v33 }
  0x99   :  { %517 = vmatprep.subr.mxu0 %v234_v38  ;;  %869 = vmatprep.subr.mxu1 %v641_v61 }
  0x9a   :  { %518 = vmatpush2.msra.mxu0 %v233_v39  ;;  %870 = vmatpush3.msra.mxu1 %v625_v62 }
  0x9b   :  { %519 = vmatprep.subr.mxu0 %v232_v40  ;;  %871 = vmatprep.subr.mxu1 %v640_v63 }
  0x9c   :  { %520 = vmatpush2.msra.mxu0 %v231_v41  ;;  %872 = vmatpush3.msra.mxu1 %v624_v0 }
  0x9d   :  { %521 = vmatprep.subr.mxu0 %v230_v42  ;;  %873 = vmatprep.subr.mxu1 %v639_v1 }
  0x9e   :  { %522 = vmatpush2.msra.mxu0 %v229_v43  ;;  %874 = vmatpush3.msra.mxu1 %v623_v2 }
  0x9f   :  { %524 = vmatmul.mubr.f32.vlgmr.msra.gmra.mxu0 %v59_v44  ;;  %875 = vmatprep.subr.mxu1 %v638_v3 }
  0xa0   :  { %529 = vmatprep.mubr.f32.mxu0 %v67_v45  ;;  %876 = vmatpush3.msra.mxu1 %v622_v4  ;;  %v738_v4 = vld [vmem:[%s1187_s5 + $0x28] sm:$0xff] }
  0xa1   :  { %877 = vmatprep.subr.mxu1 %v637_v5  ;;  %911 = vmatprep.subr.mxu0 %v748_v15  ;;  %v737_v5 = vld [vmem:[%s1187_s5 + $0x20] sm:$0xff] }
  0xa2   :  { %878 = vmatpush3.msra.mxu1 %v621_v6  ;;  %912 = vmatpush3.msra.mxu0 %v748_v15  ;;  %v736_v6 = vld [vmem:[%s1187_s5 + $0x18] sm:$0xff] }
  0xa3   :  { %530 = vmatmul.mubr.f32.gmra.mxu0 %v66_v46  ;;  %879 = vmatprep.subr.mxu1 %v636_v7  ;;  %v735_v7 = vld [vmem:[%s1187_s5 + $0x10] sm:$0xff] }
  0xa4   :  { %880 = vmatpush3.msra.mxu1 %v620_v8  ;;  %913 = vmatprep.subr.mxu0 %v747_v16  ;;  %v734_v8 = vld [vmem:[%s1187_s5 + $0x8] sm:$0xff] }
  0xa5   :  { %881 = vmatprep.subr.mxu1 %v635_v9  ;;  %914 = vmatpush3.msra.mxu0 %v747_v16  ;;  %v733_v9 = vld [vmem:[%s1187_s5] sm:$0xff] }
  0xa6   :  { %882 = vmatpush3.msra.mxu1 %v619_v10  ;;  %915 = vmatprep.subr.mxu0 %v746_v17 }
  0xa7   :  { %883 = vmatprep.subr.mxu1 %v634_v11  ;;  %916 = vmatpush3.msra.mxu0 %v746_v17  ;;  %v853_v11 = vld [vmem:[%s1186_s4] ss:$0 sm:$0xff]  ;;  %s840_s4 = sshll.u32 %s1027_s29, 4  ;;  %s841_s4 = int_to_ptr.vmem [resolvable:$true] %s840_s4 }
  0xa8   :  { %884 = vmatpush3.msra.mxu1 %v618_v12  ;;  %917 = vmatprep.subr.mxu0 %v745_v18  ;;  %s994_s30 = scalar_lea.vmem %s841_s4, 256  ;;  %p999_p11 = scmp.lt.s32.totalorder %s841_s4, %s841_s4 }
  0xa9   :  { %885 = vmatprep.subr.mxu1 %v633_v13  ;;  %918 = vmatpush3.msra.mxu0 %v745_v18  ;;  %p995_p10 = scmp.ne.s32.totalorder %s841_s4, %s994_s30  ;;  %p1000_p12 = scmp.lt.s32.totalorder %s994_s30, %s994_s30 }
  0xaa   :  { %886 = vmatpush3.msra.mxu1 %v617_v14  ;;  %919 = vmatprep.subr.mxu0 %v744_v19 }
  0xab   :  { %920 = vmatpush3.msra.mxu0 %v744_v19  ;;  %p1001_p13 = por %p1000_p12, %p999_p11 }
  0xac   :  { %921 = vmatprep.subr.mxu0 %v743_v20 }
  0xad   :  { %922 = vmatpush3.msra.mxu0 %v743_v20  ;;  %p1002_p0 = pnand %p1001_p13, %p995_p10 }
  0xae   :  { %923 = vmatprep.subr.mxu0 %v742_v21 }
  0xaf   :  { %924 = vmatpush3.msra.mxu0 %v742_v21  ;;  %v854_v21 = vld [vmem:[%s1188_s6] ss:$0 sm:$0xff] }
  0xb0   :  { %925 = vmatprep.subr.mxu0 %v741_v22 }
  0xb1   :  { %926 = vmatpush3.msra.mxu0 %v741_v22 }
  0xb2   :  { %927 = vmatprep.subr.mxu0 %v740_v23 }
  0xb3   :  { %928 = vmatpush3.msra.mxu0 %v740_v23 }
  0xb4   :  { %929 = vmatprep.subr.mxu0 %v739_v24 }
  0xb5   :  { %930 = vmatpush3.msra.mxu0 %v739_v24 }
  0xb6   :  { %931 = vmatprep.subr.mxu0 %v738_v4 }
  0xb7   :  { %932 = vmatpush3.msra.mxu0 %v738_v4 }
  0xb8   :  { %933 = vmatprep.subr.mxu0 %v737_v5 }
  0xb9   :  { %934 = vmatpush3.msra.mxu0 %v737_v5 }
  0xba   :  { %935 = vmatprep.subr.mxu0 %v736_v6 }
  0xbb   :  { %936 = vmatpush3.msra.mxu0 %v736_v6 }
  0xbc   :  { %937 = vmatprep.subr.mxu0 %v735_v7 }
  0xbd   :  { %938 = vmatpush3.msra.mxu0 %v735_v7 }
  0xbe   :  { %939 = vmatprep.subr.mxu0 %v734_v8 }
  0xbf   :  { %940 = vmatpush3.msra.mxu0 %v734_v8 }
  0xc0   :  { %941 = vmatprep.subr.mxu0 %v733_v9 }
  0xc1   :  { %942 = vmatpush3.msra.mxu0 %v733_v9 }
 0x11e   :  { %v371_v31 = vpop.f32.mrf.mxu0 }
 0x11f   :  { %v372_v39 = vadd.f32 %v371_v31, %v298_v34 }
 0x120   :  { %v373_v35 = vpop.f32.mrf.mxu0 }
 0x121   :  { %v448_v26 = vpop.f32.mrf.mxu1  ;;  %v374_v41 = vadd.f32 %v373_v35, %v302_v37 }
 0x122   :  { %v449_v43 = vadd.f32 %v448_v26, %v372_v39 }
 0x123   :  { %v450_v28 = vpop.f32.mrf.mxu1 }
 0x124   :  { %v451_v47 = vadd.f32 %v450_v28, %v374_v41 }
 0x13d   :  { %v377_v38 = vpop.f32.mrf.mxu0 }
 0x13e   :  { %v378_v44 = vadd.f32 %v377_v38, %v298_v34 }
 0x13f   :  { %v379_v42 = vpop.f32.mrf.mxu0 }
 0x140   :  { %v380_v48 = vadd.f32 %v379_v42, %v302_v37 }
 0x141   :  { %v454_v32 = vpop.f32.mrf.mxu1 }
 0x142   :  { %v455_v51 = vadd.f32 %v454_v32, %v378_v44 }
 0x143   :  { %v456_v36 = vpop.f32.mrf.mxu1 }
 0x144   :  { %v457_v56 = vadd.f32 %v456_v36, %v380_v48 }
 0x148   :  { %v602_v40 = vpop.f32.mrf.mxu1 }
 0x14a   :  { %v604_v46 = vpop.f32.mrf.mxu1 }
 0x14c   :  { %v608_v55 = vpop.f32.mrf.mxu1 }
 0x14e   :  { %v610_v0 = vpop.f32.mrf.mxu1 }
 0x15f   :  { %v525_v45 = vpop.f32.mrf.mxu0 }
 0x160   :  { %v526_v49 = vadd.f32 %v525_v45, %v449_v43 }
 0x161   :  { %v527_v50 = vpop.f32.mrf.mxu0 }
 0x162   :  { %v528_v52 = vadd.f32 %v527_v50, %v451_v47  ;;  %v603_v53 = vadd.f32 %v602_v40, %v526_v49 }
 0x163   :  { %v531_v54 = vpop.f32.mrf.mxu0 }
 0x164   :  { %v605_v57 = vadd.f32 %v604_v46, %v528_v52  ;;  %v532_v58 = vadd.f32 %v531_v54, %v455_v51  ;;  %v613_v62 = vmax.f32 %v603_v53, 0.0 }
 0x165   :  { %v533_v59 = vpop.f32.mrf.mxu0 }
 0x166   :  { %v614_v60 = vmax.f32 %v605_v57, 0.0  ;;  %v534_v61 = vadd.f32 %v533_v59, %v457_v56  ;;  %v609_v63 = vadd.f32 %v608_v55, %v532_v58 }
 0x168   :  { %v611_v1 = vadd.f32 %v610_v0, %v534_v61  ;;  %720 = vmatprep.mubr.f32.mxu1 %v614_v60  ;;  %v615_v3 = vmax.f32 %v609_v63, 0.0 }
 0x169   :  { %721 = vmatmul.mubr.f32.vlgmr.msra.gmra.mxu1 %v613_v62 }
 0x16a   :  { %v616_v2 = vmax.f32 %v611_v1, 0.0 }
 0x16c   :  { %725 = vmatprep.mubr.f32.mxu1 %v616_v2 }
 0x16d   :  { %726 = vmatmul.mubr.f32.gmra.mxu1 %v615_v3 }
 0x229   :  { %v887_v10 = vpop.f32.mrf.mxu1 }
 0x22b   :  { %v888_v12 = vpop.f32.mrf.mxu1 }
 0x22c   :  { %v889_v13 = vadd.f32 %v888_v12, %v887_v10 }
 0x22d   :  { %v890_v14 = vpop.f32.mrf.mxu1 }
 0x22e   :  { %v723_v15 = vadd.f32 %v889_v13, %v853_v11 }
 0x22f   :  { %v891_v16 = vpop.f32.mrf.mxu1 }
 0x230   :  { %v731_v17 = vmax.f32 %v723_v15, 0.0  ;;  %v892_v18 = vadd.f32 %v891_v16, %v890_v14 }
 0x232   :  { %v728_v19 = vadd.f32 %v892_v18, %v853_v11  ;;  %943 = vmatprep.mubr.f32.mxu0 %v731_v17 }
 0x234   :  { %v732_v20 = vmax.f32 %v728_v19, 0.0 }
 0x236   :  { %944 = vmatmul.mubr.f32.vlgmr.msra.gmra.mxu0 %v732_v20 }
 0x2f6   :  { %v945_v22 = vpop.f32.mrf.mxu0 }
 0x2f7   :  { %v828_v23 = vadd.f32 %v945_v22, %v854_v21 }
 0x2f8   :  { %v822_v24 = vpop.f32.mrf.mxu0 }
 0x2f9   :  { %v832_v25 = vmax.f32 %v828_v23, 0.0  ;;  %v823_v26 = vadd.f32 %v854_v21, %v822_v24 }
 0x2fb   :  { %834 = vst [vmem:[#allocation7 + $0x8] sm:$0xff] %v832_v25  ;;  %v831_v27 = vmax.f32 %v823_v26, 0.0 }
 0x2fd   :  { %833 = vst [vmem:[#allocation7] sm:$0xff] %v831_v27 }
 0x2fe   :  { %1005 = shalt.err (!%p1002_p0)
}
 0x2ff   :  { %846 = dma.vmem_to_hbm [thread:$0]  %s841_s4, 256, %s1189_s7, [#allocation4], %s1024_s11, %s1024_s11, %s1025_s12  }
 0x300   :  { %1018 = dma.done.wait [#allocation4], 256  }
 0x301   :  { %1019 = vsyncadd [#allocation4], 4294967040 }
 0x302   :  { %850 = vsyncpa [#allocation3], 1 }
 0x303   :  { %851 = vsyncpa [#allocation6], 1 }
 0x304   :  { %852 = vsyncpa [#allocation4], 1 }

</bundles_post_ra>
